<compile_context>
chip_gen: v7x
topology: tpu7x:2x2x1
jax: 0.10.0
libtpu: 0.0.40
codegen_flags: <defaults>
</compile_context>

<pallas_src>
import math
import jax
import jax.numpy as jnp
from jax.experimental import pallas as pl
from jax.experimental.pallas import tpu as pltpu

BN_EPS = 1e-5
LANE = 128
SUBLANE = 8


def _pad_up(n, m):
    return ((n + m - 1) // m) * m


# ----------------------------- Pallas kernel ------------------------------

def _make_fused_kernel(num_hidden):
    """Builds a kernel: refs = (x, w_0, p_0, ..., w_L, p_L, out).

    For hidden layers:  h = relu(h @ w + p[0]) * p[1] + p[2]   (bias, BN scale, BN shift)
    For final layer:    o = h @ w + p[0]
    Dropout is identity (eval mode).
    """
    def kernel(*refs):
        x_ref = refs[0]
        o_ref = refs[-1]
        h = x_ref[...]
        idx = 1
        for _ in range(num_hidden):
            w_ref, p_ref = refs[idx], refs[idx + 1]
            idx += 2
            y = jnp.dot(h, w_ref[...], preferred_element_type=jnp.float32)
            y = y + p_ref[0:1, :]                       # linear bias
            y = jnp.maximum(y, 0.0)                     # ReLU
            h = y * p_ref[1:2, :] + p_ref[2:3, :]       # folded BN (eval) as one FMA
            # TODO(synk): training-mode Dropout / batch-statistics BN not reproduced (eval semantics).
        w_ref, p_ref = refs[idx], refs[idx + 1]
        y = jnp.dot(h, w_ref[...], preferred_element_type=jnp.float32)
        o_ref[...] = y + p_ref[0:1, :]
    return kernel


# ----------------------------- wrapper -------------------------------------

def _full_spec(shape):
    # single grid point, full-array block (block == array dims, so (8,128) rule satisfied)
    return pl.BlockSpec(shape, lambda: tuple(0 for _ in shape))


def prepare_params(hidden_params, out_params):
    """Pad weights to 128-lane multiples and fold BN into (bias, scale, shift) packs."""
    prepared = []
    for p in hidden_params:
        din, dout = p["w"].shape
        din_p, dout_p = _pad_up(din, LANE), _pad_up(dout, LANE)
        w_pad = jnp.zeros((din_p, dout_p), jnp.float32).at[:din, :dout].set(p["w"])
        scale = p["gamma"][0] * jax.lax.rsqrt(p["var"][0] + BN_EPS)
        shift = p["beta"][0] - p["mean"][0] * scale
        packed = jnp.zeros((3, dout_p), jnp.float32)
        packed = packed.at[0, :dout].set(p["b"][0])
        packed = packed.at[1, :dout].set(scale)
        packed = packed.at[2, :dout].set(shift)
        prepared.append((w_pad, packed))
    w_out, b_out = out_params
    din, dout = w_out.shape
    din_p, dout_p = _pad_up(din, LANE), _pad_up(dout, LANE)
    w_pad = jnp.zeros((din_p, dout_p), jnp.float32).at[:din, :dout].set(w_out)
    packed = jnp.zeros((3, dout_p), jnp.float32).at[0, :dout].set(b_out[0])
    prepared.append((w_pad, packed))
    return prepared


def custom_model_forward(x, prepared, num_classes):
    """Fused forward: one pallas_call for all layers. x: (B, embeddings_size)."""
    B, D = x.shape
    Bp = _pad_up(B, SUBLANE)
    D0p = prepared[0][0].shape[0]
    Cp = prepared[-1][0].shape[1]

    x_pad = jnp.zeros((Bp, D0p), jnp.float32).at[:B, :D].set(x)

    num_hidden = len(prepared) - 1
    kernel = _make_fused_kernel(num_hidden)

    in_specs = [_full_spec(x_pad.shape)]
    args = [x_pad]
    for (w_pad, packed) in prepared:
        in_specs.append(_full_spec(w_pad.shape))
        in_specs.append(_full_spec(packed.shape))
        args.append(w_pad)
        args.append(packed)

    out_pad = pl.pallas_call(
        kernel,
        out_shape=jax.ShapeDtypeStruct((Bp, Cp), jnp.float32),
        grid=(),
        in_specs=in_specs,
        out_specs=_full_spec((Bp, Cp)),
        compiler_params=pltpu.CompilerParams(vmem_limit_bytes=64 << 20),
    )(*args)
    return out_pad[:B, :num_classes]


# ----------------------------- parameter init ------------------------------

def init_params(key, embeddings_size, hidden_layer_sizes, num_classes):
    """Deterministic init mirroring the PyTorch module's __init__ (eval-mode BN stats)."""
    params = []
    in_size = embeddings_size
    for size in hidden_layer_sizes:
        key, kw, kb = jax.random.split(key, 3)
        bound_w = math.sqrt(6.0 / in_size)            # kaiming_uniform_, relu
        w = jax.random.uniform(kw, (in_size, size), jnp.float32,
                               minval=-bound_w, maxval=bound_w)
        bound_b = 1.0 / math.sqrt(in_size)            # nn.Linear default bias init
        b = jax.random.uniform(kb, (1, size), jnp.float32,
                               minval=-bound_b, maxval=bound_b)
        gamma = jnp.ones((1, size), jnp.float32)      # BatchNorm1d defaults
        beta = jnp.zeros((1, size), jnp.float32)
        mean = jnp.zeros((1, size), jnp.float32)
        var = jnp.ones((1, size), jnp.float32)
        params.append(dict(w=w, b=b, gamma=gamma, beta=beta, mean=mean, var=var))
        in_size = size
    key, kw, kb = jax.random.split(key, 3)
    bound = 1.0 / math.sqrt(in_size)                  # final Linear default init
    w_out = jax.random.uniform(kw, (in_size, num_classes), jnp.float32,
                               minval=-bound, maxval=bound)
    b_out = jax.random.uniform(kb, (1, num_classes), jnp.float32,
                               minval=-bound, maxval=bound)
    return params, (w_out, b_out)


# ----------------------------- reference (plain JAX) ------------------------

def reference_forward(x, hidden_params, out_params):
    h = x
    for p in hidden_params:
        y = h @ p["w"] + p["b"]
        y = jnp.maximum(y, 0.0)
        h = (y - p["mean"]) / jnp.sqrt(p["var"] + BN_EPS) * p["gamma"] + p["beta"]
    w_out, b_out = out_params
    return h @ w_out + b_out


if __name__ == "__main__":
    embeddings_size = 32
    hidden_layer_sizes = [64, 32]
    num_classes = 8
    batch = 8

    key = jax.random.PRNGKey(0)
    key_params, key_x = jax.random.split(key)
    hidden_params, out_params = init_params(
        key_params, embeddings_size, hidden_layer_sizes, num_classes)

    x = jax.random.normal(key_x, (batch, embeddings_size), jnp.float32)

    prepared = prepare_params(hidden_params, out_params)
    out = custom_model_forward(x, prepared, num_classes)
    out = jax.block_until_ready(out)

    ref = reference_forward(x, hidden_params, out_params)
    assert out.shape == (batch, num_classes)
    assert jnp.allclose(out, ref, atol=1e-4, rtol=1e-4)

    print("KERNEL_OK")
</pallas_src>

<mosaic_0001>
module attributes {stable_mosaic.version = 11 : i64} {
  func.func @kernel(%arg0: memref<8x128xf32, #tpu.memory_space<vmem>>, %arg1: memref<128x128xf32, #tpu.memory_space<vmem>>, %arg2: memref<3x128xf32, #tpu.memory_space<vmem>>, %arg3: memref<128x128xf32, #tpu.memory_space<vmem>>, %arg4: memref<3x128xf32, #tpu.memory_space<vmem>>, %arg5: memref<128x128xf32, #tpu.memory_space<vmem>>, %arg6: memref<3x128xf32, #tpu.memory_space<vmem>>, %arg7: memref<8x128xf32, #tpu.memory_space<vmem>>) attributes {dimension_semantics = [], scalar_prefetch = 0 : i64, scratch_operands = 0 : i64, tpu.core_type = #tpu.core_type<tc>} {
    %c0 = arith.constant 0 : index
    %c0_0 = arith.constant 0 : index
    %0 = vector.load %arg0[%c0, %c0_0] : memref<8x128xf32, #tpu.memory_space<vmem>>, vector<8x128xf32>
    %c0_1 = arith.constant 0 : index
    %c0_2 = arith.constant 0 : index
    %1 = vector.load %arg1[%c0_1, %c0_2] : memref<128x128xf32, #tpu.memory_space<vmem>>, vector<128x128xf32>
    %cst = arith.constant dense<0.000000e+00> : vector<8x128xf32>
    %2 = tpu.matmul %0, %1, %cst {dimension_numbers = #tpu.dot_dimension_numbers<[1], [0], [0], [1], [0, 0, 1, 1], [], []>} : vector<8x128xf32>, vector<128x128xf32>, vector<8x128xf32> -> vector<8x128xf32>
    %c0_3 = arith.constant 0 : index
    %c0_4 = arith.constant 0 : index
    %3 = vector.load %arg2[%c0_3, %c0_4] : memref<3x128xf32, #tpu.memory_space<vmem>>, vector<1x128xf32>
    %4 = vector.broadcast %3 : vector<1x128xf32> to vector<8x128xf32>
    %5 = arith.addf %2, %4 : vector<8x128xf32>
    %cst_5 = arith.constant 0.000000e+00 : f32
    %6 = vector.broadcast %cst_5 : f32 to vector<8x128xf32>
    %7 = arith.maximumf %5, %6 : vector<8x128xf32>
    %c1 = arith.constant 1 : index
    %c0_6 = arith.constant 0 : index
    %8 = vector.load %arg2[%c1, %c0_6] : memref<3x128xf32, #tpu.memory_space<vmem>>, vector<1x128xf32>
    %9 = vector.broadcast %8 : vector<1x128xf32> to vector<8x128xf32>
    %10 = arith.mulf %7, %9 : vector<8x128xf32>
    %c2 = arith.constant 2 : index
    %c0_7 = arith.constant 0 : index
    %11 = vector.load %arg2[%c2, %c0_7] : memref<3x128xf32, #tpu.memory_space<vmem>>, vector<1x128xf32>
    %12 = vector.broadcast %11 : vector<1x128xf32> to vector<8x128xf32>
    %13 = arith.addf %10, %12 : vector<8x128xf32>
    %c0_8 = arith.constant 0 : index
    %c0_9 = arith.constant 0 : index
    %14 = vector.load %arg3[%c0_8, %c0_9] : memref<128x128xf32, #tpu.memory_space<vmem>>, vector<128x128xf32>
    %cst_10 = arith.constant dense<0.000000e+00> : vector<8x128xf32>
    %15 = tpu.matmul %13, %14, %cst_10 {dimension_numbers = #tpu.dot_dimension_numbers<[1], [0], [0], [1], [0, 0, 1, 1], [], []>} : vector<8x128xf32>, vector<128x128xf32>, vector<8x128xf32> -> vector<8x128xf32>
    %c0_11 = arith.constant 0 : index
    %c0_12 = arith.constant 0 : index
    %16 = vector.load %arg4[%c0_11, %c0_12] : memref<3x128xf32, #tpu.memory_space<vmem>>, vector<1x128xf32>
    %17 = vector.broadcast %16 : vector<1x128xf32> to vector<8x128xf32>
    %18 = arith.addf %15, %17 : vector<8x128xf32>
    %cst_13 = arith.constant 0.000000e+00 : f32
    %19 = vector.broadcast %cst_13 : f32 to vector<8x128xf32>
    %20 = arith.maximumf %18, %19 : vector<8x128xf32>
    %c1_14 = arith.constant 1 : index
    %c0_15 = arith.constant 0 : index
    %21 = vector.load %arg4[%c1_14, %c0_15] : memref<3x128xf32, #tpu.memory_space<vmem>>, vector<1x128xf32>
    %22 = vector.broadcast %21 : vector<1x128xf32> to vector<8x128xf32>
    %23 = arith.mulf %20, %22 : vector<8x128xf32>
    %c2_16 = arith.constant 2 : index
    %c0_17 = arith.constant 0 : index
    %24 = vector.load %arg4[%c2_16, %c0_17] : memref<3x128xf32, #tpu.memory_space<vmem>>, vector<1x128xf32>
    %25 = vector.broadcast %24 : vector<1x128xf32> to vector<8x128xf32>
    %26 = arith.addf %23, %25 : vector<8x128xf32>
    %c0_18 = arith.constant 0 : index
    %c0_19 = arith.constant 0 : index
    %27 = vector.load %arg5[%c0_18, %c0_19] : memref<128x128xf32, #tpu.memory_space<vmem>>, vector<128x128xf32>
    %cst_20 = arith.constant dense<0.000000e+00> : vector<8x128xf32>
    %28 = tpu.matmul %26, %27, %cst_20 {dimension_numbers = #tpu.dot_dimension_numbers<[1], [0], [0], [1], [0, 0, 1, 1], [], []>} : vector<8x128xf32>, vector<128x128xf32>, vector<8x128xf32> -> vector<8x128xf32>
    %c0_21 = arith.constant 0 : index
    %c0_22 = arith.constant 0 : index
    %29 = vector.load %arg6[%c0_21, %c0_22] : memref<3x128xf32, #tpu.memory_space<vmem>>, vector<1x128xf32>
    %30 = vector.broadcast %29 : vector<1x128xf32> to vector<8x128xf32>
    %31 = arith.addf %28, %30 : vector<8x128xf32>
    %c0_23 = arith.constant 0 : index
    %c0_24 = arith.constant 0 : index
    %32 = vector.load %arg7[%c0_23, %c0_24] : memref<8x128xf32, #tpu.memory_space<vmem>>, vector<8x128xf32>
    tpu.vector_store %arg7[%c0_23, %c0_24], %31 {strides = array<i32>} : memref<8x128xf32, #tpu.memory_space<vmem>>, vector<8x128xf32>,
    return
  }
}

</mosaic_0001>

<bundles_post_ra>
// kernel: tpu_custom_call.1
= control target key start
LH: loop header
LB: loop body
LE: loop exit
PB: predicated region body
PF: predicated region fallthrough
CT: control target
= control target key end

     0   :  { %12 = vsyncpa [#allocation3], 0  ;;  %s1055_s0 = inlined_call_operand.hbm [shape: f32[8,128], index: 0, kind: input, shape index: {}]   ;;  %s1056_s1 = inlined_call_operand.hbm [shape: f32[128,128], index: 1, kind: input, shape index: {}]   ;;  %s1057_s2 = inlined_call_operand.hbm [shape: f32[3,128], index: 2, kind: input, shape index: {}]   ;;  %s1058_s3 = inlined_call_operand.hbm [shape: f32[128,128], index: 3, kind: input, shape index: {}]   ;;  %s1059_s4 = inlined_call_operand.hbm [shape: f32[3,128], index: 4, kind: input, shape index: {}]   ;;  %s1060_s5 = inlined_call_operand.hbm [shape: f32[128,128], index: 5, kind: input, shape index: {}]   ;;  %s1061_s6 = inlined_call_operand.hbm [shape: f32[3,128], index: 6, kind: input, shape index: {}]   ;;  %s1062_s7 = inlined_call_operand.hbm [shape: f32[8,128], index: 7, kind: output, shape index: {}]  }
   0x1   :  { %13 = vsyncpa [#allocation6], 0 }
   0x2   :  { %14 = vsyncpa [#allocation9], 0 }
   0x3   :  { %15 = vsyncpa [#allocation12], 0 }
   0x4   :  { %16 = vsyncpa [#allocation4], 0  ;;  %s867_s24 = smov [#allocation5]   ;;  %s681_s28 = scalar_lea.hbm %s1056_s1, 2048 }
   0x5   :  { %s32_s25 = sshll.u32 %s867_s24, 4  ;;  %p682_p0 = scmp.ne.s32.totalorder %s1056_s1, %s681_s28  ;;  %s33_s25 = int_to_ptr.vmem [resolvable:$true] %s32_s25 }
   0x6   :  { %p685_p1 = scmp.lt.u32.totalorder %s681_s28, %s1056_s1 }
   0x8   :  { %p687_p2 = pnand %p685_p1, %p682_p0 }
   0xa   :  { %690 = shalt.err (!%p687_p2)
}
   0xb   :  { %s691_s10 = scalar_lea.vmem %s33_s25, 2048  ;;  %p696_p4 = scmp.lt.s32.totalorder %s33_s25, %s33_s25 }
   0xc   :  { %p692_p3 = scmp.ne.s32.totalorder %s33_s25, %s691_s10  ;;  %p697_p5 = scmp.lt.s32.totalorder %s691_s10, %s691_s10 }
   0xe   :  { %p698_p6 = por %p697_p5, %p696_p4 }
  0x10   :  { %p699_p7 = pnand %p698_p6, %p692_p3 }
  0x12   :  { %702 = shalt.err (!%p699_p7)
}
  0x13   :  { %s868_s11 = smov 128   ;;  %s869_s12 = smov 8  }
  0x14   :  { %38 = dma.hbm_to_vmem [thread:$0]  %s1056_s1, 2048, %s33_s25, [#allocation6], %s868_s11, %s868_s11, %s869_s12  }
  0x15   :  { %s870_s15 = smov [#allocation8]   ;;  %s871_s17 = smov [#allocation11]  }
  0x16   :  { %s54_s16 = sshll.u32 %s870_s15, 4  ;;  %s76_s18 = sshll.u32 %s871_s17, 4  ;;  %s55_s16 = int_to_ptr.vmem [resolvable:$true] %s54_s16  ;;  %s77_s18 = int_to_ptr.vmem [resolvable:$true] %s76_s18 }
  0x17   :  { %s703_s21 = scalar_lea.hbm %s1058_s3, 2048 }
  0x18   :  { %p704_p8 = scmp.ne.s32.totalorder %s1058_s3, %s703_s21  ;;  %p707_p9 = scmp.lt.u32.totalorder %s703_s21, %s1058_s3 }
  0x1a   :  { %p709_p10 = pnand %p707_p9, %p704_p8 }
  0x1c   :  { %712 = shalt.err (!%p709_p10)
}
  0x1d   :  { %s713_s1 = scalar_lea.vmem %s55_s16, 2048  ;;  %p718_p12 = scmp.lt.s32.totalorder %s55_s16, %s55_s16 }
  0x1e   :  { %p714_p11 = scmp.ne.s32.totalorder %s55_s16, %s713_s1  ;;  %p719_p13 = scmp.lt.s32.totalorder %s713_s1, %s713_s1 }
  0x20   :  { %p720_p0 = por %p719_p13, %p718_p12 }
  0x22   :  { %p721_p1 = pnand %p720_p0, %p714_p11 }
  0x24   :  { %724 = shalt.err (!%p721_p1)
}
  0x25   :  { %60 = dma.hbm_to_vmem [thread:$0]  %s1058_s3, 2048, %s55_s16, [#allocation9], %s868_s11, %s868_s11, %s869_s12  }
  0x26   :  { %s725_s30 = scalar_lea.hbm %s1060_s5, 2048 }
  0x27   :  { %p726_p2 = scmp.ne.s32.totalorder %s1060_s5, %s725_s30  ;;  %p729_p3 = scmp.lt.u32.totalorder %s725_s30, %s1060_s5 }
  0x29   :  { %p731_p4 = pnand %p729_p3, %p726_p2 }
  0x2b   :  { %734 = shalt.err (!%p731_p4)
}
  0x2c   :  { %s735_s14 = scalar_lea.vmem %s77_s18, 2048  ;;  %p740_p6 = scmp.lt.s32.totalorder %s77_s18, %s77_s18 }
  0x2d   :  { %p736_p5 = scmp.ne.s32.totalorder %s77_s18, %s735_s14  ;;  %p741_p7 = scmp.lt.s32.totalorder %s735_s14, %s735_s14 }
  0x2f   :  { %p742_p8 = por %p741_p7, %p740_p6 }
  0x31   :  { %p743_p9 = pnand %p742_p8, %p736_p5 }
  0x33   :  { %746 = shalt.err (!%p743_p9)
}
  0x34   :  { %82 = dma.hbm_to_vmem [thread:$0]  %s1060_s5, 2048, %s77_s18, [#allocation12], %s868_s11, %s868_s11, %s869_s12  }
  0x35   :  { %s872_s16 = smov [#allocation2]   ;;  %s873_s19 = smov [#allocation7]  }
  0x36   :  { %s23_s17 = sshll.u32 %s872_s16, 4  ;;  %s45_s20 = sshll.u32 %s873_s19, 4  ;;  %s24_s17 = int_to_ptr.vmem [resolvable:$true] %s23_s17  ;;  %s46_s20 = int_to_ptr.vmem [resolvable:$true] %s45_s20 }
  0x37   :  { %s747_s23 = scalar_lea.hbm %s1055_s0, 128 }
  0x38   :  { %p748_p10 = scmp.ne.s32.totalorder %s1055_s0, %s747_s23  ;;  %p751_p11 = scmp.lt.u32.totalorder %s747_s23, %s1055_s0 }
  0x3a   :  { %p753_p12 = pnand %p751_p11, %p748_p10 }
  0x3c   :  { %756 = shalt.err (!%p753_p12)
}
  0x3d   :  { %s757_s5 = scalar_lea.vmem %s24_s17, 128  ;;  %p762_p0 = scmp.lt.s32.totalorder %s24_s17, %s24_s17 }
  0x3e   :  { %p758_p13 = scmp.ne.s32.totalorder %s24_s17, %s757_s5  ;;  %p763_p1 = scmp.lt.s32.totalorder %s757_s5, %s757_s5 }
  0x40   :  { %p764_p2 = por %p763_p1, %p762_p0 }
  0x42   :  { %p765_p3 = pnand %p764_p2, %p758_p13 }
  0x44   :  { %768 = shalt.err (!%p765_p3)
}
  0x45   :  { %26 = dma.hbm_to_vmem [thread:$0]  %s1055_s0, 128, %s24_s17, [#allocation3]  }
  0x46   :  { %s769_s28 = scalar_lea.hbm %s1057_s2, 64 }
  0x47   :  { %p770_p4 = scmp.ne.s32.totalorder %s1057_s2, %s769_s28  ;;  %p773_p5 = scmp.lt.u32.totalorder %s769_s28, %s1057_s2 }
  0x49   :  { %p775_p6 = pnand %p773_p5, %p770_p4 }
  0x4b   :  { %778 = shalt.err (!%p775_p6)
}
  0x4c   :  { %s779_s10 = scalar_lea.vmem %s46_s20, 64  ;;  %p784_p8 = scmp.lt.s32.totalorder %s46_s20, %s46_s20 }
  0x4d   :  { %p780_p7 = scmp.ne.s32.totalorder %s46_s20, %s779_s10  ;;  %p785_p9 = scmp.lt.s32.totalorder %s779_s10, %s779_s10 }
  0x4f   :  { %p786_p10 = por %p785_p9, %p784_p8 }
  0x51   :  { %p787_p11 = pnand %p786_p10, %p780_p7 }
  0x53   :  { %790 = shalt.err (!%p787_p11)
}
  0x54   :  { %48 = dma.hbm_to_vmem [thread:$0]  %s1057_s2, 64, %s46_s20, [#allocation6]  }
  0x55   :  { %s874_s14 = smov [#allocation10]   ;;  %s875_s15 = smov [#allocation13]  }
  0x56   :  { %s67_s3 = sshll.u32 %s874_s14, 4  ;;  %s89_s16 = sshll.u32 %s875_s15, 4  ;;  %s68_s3 = int_to_ptr.vmem [resolvable:$true] %s67_s3  ;;  %s90_s16 = int_to_ptr.vmem [resolvable:$true] %s89_s16 }
  0x57   :  { %s791_s21 = scalar_lea.hbm %s1059_s4, 64 }
  0x58   :  { %p792_p12 = scmp.ne.s32.totalorder %s1059_s4, %s791_s21  ;;  %p795_p13 = scmp.lt.u32.totalorder %s791_s21, %s1059_s4 }
  0x5a   :  { %p797_p0 = pnand %p795_p13, %p792_p12 }
  0x5c   :  { %800 = shalt.err (!%p797_p0)
}
  0x5d   :  { %s801_s2 = scalar_lea.vmem %s68_s3, 64  ;;  %p806_p2 = scmp.lt.s32.totalorder %s68_s3, %s68_s3 }
  0x5e   :  { %p802_p1 = scmp.ne.s32.totalorder %s68_s3, %s801_s2  ;;  %p807_p3 = scmp.lt.s32.totalorder %s801_s2, %s801_s2 }
  0x60   :  { %p808_p4 = por %p807_p3, %p806_p2 }
  0x62   :  { %p809_p5 = pnand %p808_p4, %p802_p1 }
  0x64   :  { %812 = shalt.err (!%p809_p5)
}
  0x65   :  { %70 = dma.hbm_to_vmem [thread:$0]  %s1059_s4, 64, %s68_s3, [#allocation9]  }
  0x66   :  { %s813_s11 = scalar_lea.hbm %s1061_s6, 64 }
  0x67   :  { %p814_p6 = scmp.ne.s32.totalorder %s1061_s6, %s813_s11  ;;  %p817_p7 = scmp.lt.u32.totalorder %s813_s11, %s1061_s6 }
  0x69   :  { %p819_p8 = pnand %p817_p7, %p814_p6 }
  0x6b   :  { %822 = shalt.err (!%p819_p8)
}
  0x6c   :  { %s823_s29 = scalar_lea.vmem %s90_s16, 64  ;;  %p828_p10 = scmp.lt.s32.totalorder %s90_s16, %s90_s16 }
  0x6d   :  { %p824_p9 = scmp.ne.s32.totalorder %s90_s16, %s823_s29  ;;  %p829_p11 = scmp.lt.s32.totalorder %s823_s29, %s823_s29 }
  0x6f   :  { %p830_p12 = por %p829_p11, %p828_p10 }
  0x71   :  { %p831_p13 = pnand %p830_p12, %p824_p9 }
  0x73   :  { %834 = shalt.err (!%p831_p13)
}
  0x74   :  { %92 = dma.hbm_to_vmem [thread:$0]  %s1061_s6, 64, %s90_s16, [#allocation12]  }
  0x75   :  { %857 = dma.done.wait [#allocation3], 128  }
  0x76   :  { %858 = vsyncadd [#allocation3], 4294967168 }
  0x77   :  { %859 = dma.done.wait [#allocation6], 2112  }
  0x78   :  { %860 = vsyncadd [#allocation6], 4294965184 }
  0x79   :  { %861 = dma.done.wait [#allocation9], 2112  }
  0x7a   :  { %862 = vsyncadd [#allocation9], 4294965184 }
  0x7b   :  { %863 = dma.done.wait [#allocation12], 2112  }
  0x7c   :  { %864 = vsyncadd [#allocation12], 4294965184  ;;  %v876_v0 = vmov 0.0|0.0   ;;  %vm877_vm0 = vmmov 0   ;;  %v878_v1 = vmov 0.0   ;;  %v115_v2 = vld [vmem:[#allocation5] sm:$0xff] }
  0x7d   :  { %596 = vmatprep.subr.bf16.mxu0 %v876_v0  ;;  %523 = vmatprep.mubr.msk.f32.mxu0 %vm877_vm0, %v878_v1  ;;  %v116_v3 = vld [vmem:[#allocation5 + $0x8] sm:$0xff]  ;;  %v117_v4 = vld [vmem:[#allocation5 + $0x10] sm:$0xff]  ;;  %v118_v6 = vld [vmem:[#allocation5 + $0x18] sm:$0xff]  ;;  %s879_s6 = smov [#allocation14]  }
  0x7e   :  { %620 = vmatprep.subr.bf16.mxu1 %v876_v0  ;;  %558 = vmatprep.mubr.msk.f32.mxu1 %vm877_vm0, %v878_v1  ;;  %v597_v5 = vpack.c.bf16 %v116_v3, %v115_v2  ;;  %v600_v7 = vpack.c.bf16 %v118_v6, %v117_v4  ;;  %v119_v8 = vld [vmem:[#allocation5 + $0x20] sm:$0xff]  ;;  %v120_v9 = vld [vmem:[#allocation5 + $0x28] sm:$0xff]  ;;  %v221_v12 = vld [vmem:[#allocation8 + $0x10] sm:$0xff]  ;;  %s421_s8 = sshll.u32 %s879_s6, 4  ;;  %s422_s8 = int_to_ptr.vmem [resolvable:$true] %s421_s8 }
  0x7f   :  { %v219_v10 = vld [vmem:[#allocation8] sm:$0xff]  ;;  %v220_v11 = vld [vmem:[#allocation8 + $0x8] sm:$0xff]  ;;  %v222_v13 = vld [vmem:[#allocation8 + $0x18] sm:$0xff]  ;;  %v603_v14 = vpack.c.bf16 %v120_v9, %v119_v8  ;;  %s835_s9 = scalar_lea.vmem %s422_s8, 128  ;;  %p840_p1 = scmp.lt.s32.totalorder %s422_s8, %s422_s8 }
  0x80   :  { %598 = vmatpush3.bf16.msra.mxu0 %v597_v5  ;;  %v621_v15 = vpack.c.bf16 %v220_v11, %v219_v10  ;;  %v121_v16 = vld [vmem:[#allocation5 + $0x30] sm:$0xff]  ;;  %v122_v17 = vld [vmem:[#allocation5 + $0x38] sm:$0xff]  ;;  %v624_v18 = vpack.c.bf16 %v222_v13, %v221_v12  ;;  %v223_v19 = vld [vmem:[#allocation8 + $0x20] sm:$0xff]  ;;  %p836_p0 = scmp.ne.s32.totalorder %s422_s8, %s835_s9  ;;  %p841_p2 = scmp.lt.s32.totalorder %s835_s9, %s835_s9 }
  0x81   :  { %599 = vmatprep.subr.bf16.mxu0 %v876_v0  ;;  %v224_v20 = vld [vmem:[#allocation8 + $0x28] sm:$0xff]  ;;  %v606_v21 = vpack.c.bf16 %v122_v17, %v121_v16  ;;  %v123_v22 = vld [vmem:[#allocation5 + $0x40] sm:$0xff]  ;;  %v225_v25 = vld [vmem:[#allocation8 + $0x30] sm:$0xff] }
  0x82   :  { %622 = vmatpush3.bf16.msra.mxu1 %v621_v15  ;;  %v124_v23 = vld [vmem:[#allocation5 + $0x48] sm:$0xff]  ;;  %v627_v24 = vpack.c.bf16 %v224_v20, %v223_v19  ;;  %v226_v26 = vld [vmem:[#allocation8 + $0x38] sm:$0xff]  ;;  %v125_v28 = vld [vmem:[#allocation5 + $0x50] sm:$0xff]  ;;  %p842_p3 = por %p841_p2, %p840_p1 }
  0x83   :  { %623 = vmatprep.subr.bf16.mxu1 %v876_v0  ;;  %v609_v27 = vpack.c.bf16 %v124_v23, %v123_v22  ;;  %v126_v29 = vld [vmem:[#allocation5 + $0x58] sm:$0xff]  ;;  %v630_v30 = vpack.c.bf16 %v226_v26, %v225_v25  ;;  %v227_v31 = vld [vmem:[#allocation8 + $0x40] sm:$0xff]  ;;  %v228_v32 = vld [vmem:[#allocation8 + $0x48] sm:$0xff] }
  0x84   :  { %601 = vmatpush3.bf16.msra.mxu0 %v600_v7  ;;  %v612_v33 = vpack.c.bf16 %v126_v29, %v125_v28  ;;  %v127_v34 = vld [vmem:[#allocation5 + $0x60] sm:$0xff]  ;;  %v128_v35 = vld [vmem:[#allocation5 + $0x68] sm:$0xff]  ;;  %v633_v36 = vpack.c.bf16 %v228_v32, %v227_v31  ;;  %v229_v37 = vld [vmem:[#allocation8 + $0x50] sm:$0xff]  ;;  %p843_p4 = pnand %p842_p3, %p836_p0 }
  0x85   :  { %602 = vmatprep.subr.bf16.mxu0 %v876_v0  ;;  %v230_v38 = vld [vmem:[#allocation8 + $0x58] sm:$0xff]  ;;  %v615_v39 = vpack.c.bf16 %v128_v35, %v127_v34  ;;  %v129_v40 = vld [vmem:[#allocation5 + $0x70] sm:$0xff]  ;;  %v231_v45 = vld [vmem:[#allocation8 + $0x60] sm:$0xff] }
  0x86   :  { %625 = vmatpush3.bf16.msra.mxu1 %v624_v18  ;;  %v130_v41 = vld [vmem:[#allocation5 + $0x78] sm:$0xff]  ;;  %v636_v42 = vpack.c.bf16 %v230_v38, %v229_v37  ;;  %v232_v46 = vld [vmem:[#allocation8 + $0x68] sm:$0xff]  ;;  %v326_v55 = vld [vmem:[#allocation11 + $0x18] sm:$0xff] }
  0x87   :  { %626 = vmatprep.subr.bf16.mxu1 %v876_v0  ;;  %v618_v43 = vpack.c.bf16 %v130_v41, %v129_v40  ;;  %v114_v44 = vld [vmem:[#allocation2] sm:$0xff]  ;;  %v639_v47 = vpack.c.bf16 %v232_v46, %v231_v45  ;;  %v323_v51 = vld [vmem:[#allocation11] sm:$0xff]  ;;  %v324_v52 = vld [vmem:[#allocation11 + $0x8] sm:$0xff] }
  0x88   :  { %604 = vmatpush3.bf16.msra.mxu0 %v603_v14  ;;  %v233_v48 = vld [vmem:[#allocation8 + $0x70] sm:$0xff]  ;;  %v234_v49 = vld [vmem:[#allocation8 + $0x78] sm:$0xff]  ;;  %v645_v54 = vpack.c.bf16 %v324_v52, %v323_v51  ;;  %v327_v57 = vld [vmem:[#allocation11 + $0x20] sm:$0xff] }
  0x89   :  { %605 = vmatprep.subr.bf16.mxu0 %v876_v0  ;;  %v642_v50 = vpack.c.bf16 %v234_v49, %v233_v48  ;;  %v325_v53 = vld [vmem:[#allocation11 + $0x10] sm:$0xff]  ;;  %v328_v58 = vld [vmem:[#allocation11 + $0x28] sm:$0xff]  ;;  %v330_v61 = vld [vmem:[#allocation11 + $0x38] sm:$0xff] }
  0x8a   :  { %628 = vmatpush3.bf16.msra.mxu1 %v627_v24  ;;  %v648_v56 = vpack.c.bf16 %v326_v55, %v325_v53  ;;  %v651_v59 = vpack.c.bf16 %v328_v58, %v327_v57  ;;  %v329_v60 = vld [vmem:[#allocation11 + $0x30] sm:$0xff]  ;;  %v331_v63 = vld [vmem:[#allocation11 + $0x40] sm:$0xff]  ;;  %v334_v4 = vld [vmem:[#allocation11 + $0x58] sm:$0xff] }
  0x8b   :  { %629 = vmatprep.subr.bf16.mxu1 %v876_v0  ;;  %v654_v62 = vpack.c.bf16 %v330_v61, %v329_v60  ;;  %v333_v3 = vld [vmem:[#allocation11 + $0x50] sm:$0xff]  ;;  %v433_v6 = vld [vmem:[#allocation7] ss:$0 sm:$0xff]  ;;  %v434_v10 = vld [vmem:[#allocation7 + $0x1] ss:$0 sm:$0xff] }
  0x8c   :  { %607 = vmatpush3.bf16.msra.mxu0 %v606_v21  ;;  %v660_v5 = vpack.c.bf16 %v334_v4, %v333_v3  ;;  %v435_v12 = vld [vmem:[#allocation7 + $0x2] ss:$0 sm:$0xff]  ;;  %v335_v15 = vld [vmem:[#allocation11 + $0x60] sm:$0xff]  ;;  %v336_v16 = vld [vmem:[#allocation11 + $0x68] sm:$0xff] }
  0x8d   :  { %608 = vmatprep.subr.bf16.mxu0 %v876_v0  ;;  %v663_v17 = vpack.c.bf16 %v336_v16, %v335_v15  ;;  %v337_v18 = vld [vmem:[#allocation11 + $0x70] sm:$0xff]  ;;  %v338_v19 = vld [vmem:[#allocation11 + $0x78] sm:$0xff] }
  0x8e   :  { %631 = vmatpush3.bf16.msra.mxu1 %v630_v30  ;;  %v666_v20 = vpack.c.bf16 %v338_v19, %v337_v18  ;;  %v436_v21 = vld [vmem:[#allocation10] ss:$0 sm:$0xff]  ;;  %v437_v25 = vld [vmem:[#allocation10 + $0x1] ss:$0 sm:$0xff]  ;;  %v439_v30 = vld [vmem:[#allocation13] ss:$0 sm:$0xff] }
  0x8f   :  { %632 = vmatprep.subr.bf16.mxu1 %v876_v0 }
  0x90   :  { %610 = vmatpush3.bf16.msra.mxu0 %v609_v27  ;;  %v438_v27 = vld [vmem:[#allocation10 + $0x2] ss:$0 sm:$0xff] }
  0x91   :  { %611 = vmatprep.subr.bf16.mxu0 %v876_v0 }
  0x92   :  { %634 = vmatpush3.bf16.msra.mxu1 %v633_v36 }
  0x93   :  { %635 = vmatprep.subr.bf16.mxu1 %v876_v0 }
  0x94   :  { %613 = vmatpush3.bf16.msra.mxu0 %v612_v33 }
  0x95   :  { %614 = vmatprep.subr.bf16.mxu0 %v876_v0 }
  0x96   :  { %637 = vmatpush3.bf16.msra.mxu1 %v636_v42 }
  0x97   :  { %638 = vmatprep.subr.bf16.mxu1 %v876_v0 }
  0x98   :  { %616 = vmatpush3.bf16.msra.mxu0 %v615_v39 }
  0x99   :  { %617 = vmatprep.subr.bf16.mxu0 %v876_v0 }
  0x9a   :  { %640 = vmatpush3.bf16.msra.mxu1 %v639_v47 }
  0x9b   :  { %641 = vmatprep.subr.bf16.mxu1 %v876_v0 }
  0x9c   :  { %619 = vmatpush3.bf16.msra.mxu0 %v618_v43 }
  0x9d   :  { %644 = vmatprep.subr.bf16.mxu0 %v876_v0 }
  0x9e   :  { %643 = vmatpush3.bf16.msra.mxu1 %v642_v50 }
  0x9f   :  { %524 = vmatmul.mubr.f32.vlgmr.msra.gmra.mrb[0].mxu0 %v114_v44 }
  0xa0   :  { %593 = vmatprep.mubr.msk.f32.mxu0 %vm877_vm0, %v878_v1  ;;  %646 = vmatpush3.bf16.msra.mxu0 %v645_v54  ;;  %v332_v1 = vld [vmem:[#allocation11 + $0x48] sm:$0xff] }
  0xa1   :  { %647 = vmatprep.subr.bf16.mxu0 %v876_v0  ;;  %v657_v2 = vpack.c.bf16 %v332_v1, %v331_v63 }
  0xa4   :  { %649 = vmatpush3.bf16.msra.mxu0 %v648_v56 }
  0xa5   :  { %650 = vmatprep.subr.bf16.mxu0 %v876_v0 }
  0xa8   :  { %652 = vmatpush3.bf16.msra.mxu0 %v651_v59 }
  0xa9   :  { %653 = vmatprep.subr.bf16.mxu0 %v876_v0 }
  0xac   :  { %655 = vmatpush3.bf16.msra.mxu0 %v654_v62 }
  0xad   :  { %656 = vmatprep.subr.bf16.mxu0 %v876_v0 }
  0xb0   :  { %658 = vmatpush3.bf16.msra.mxu0 %v657_v2 }
  0xb1   :  { %659 = vmatprep.subr.bf16.mxu0 %v876_v0 }
  0xb4   :  { %661 = vmatpush3.bf16.msra.mxu0 %v660_v5 }
  0xb5   :  { %662 = vmatprep.subr.bf16.mxu0 %v876_v0 }
  0xb8   :  { %664 = vmatpush3.bf16.msra.mxu0 %v663_v17 }
  0xb9   :  { %665 = vmatprep.subr.bf16.mxu0 %v876_v0 }
  0xbc   :  { %667 = vmatpush3.bf16.msra.mxu0 %v666_v20 }
 0x172   :  { %v202_v7 = vpop.f32.mrb[0].mxu0 }
 0x173   :  { %v203_v8 = vadd.f32 %v433_v6, %v202_v7  ;;  %v525_v9 = vpop.f32.mrb[1].mxu0 }
 0x175   :  { %v206_v11 = vmax.f32 %v203_v8, 0.0 }
 0x177   :  { %v212_v13 = vmul.f32 %v434_v10, %v206_v11 }
 0x179   :  { %v218_v14 = vadd.f32 %v435_v12, %v212_v13 }
 0x17b   :  { %559 = vmatmul.mubr.f32.vlgmr.msra.gmra.mrb[0].mxu1 %v218_v14 }
 0x24e   :  { %v306_v22 = vpop.f32.mrb[0].mxu1 }
 0x24f   :  { %v307_v23 = vadd.f32 %v436_v21, %v306_v22  ;;  %v560_v24 = vpop.f32.mrb[1].mxu1 }
 0x251   :  { %v310_v26 = vmax.f32 %v307_v23, 0.0 }
 0x253   :  { %v316_v28 = vmul.f32 %v437_v25, %v310_v26 }
 0x255   :  { %v322_v29 = vadd.f32 %v438_v27, %v316_v28 }
 0x257   :  { %594 = vmatmul.mubr.f32.vlgmr.msra.gmra.mrb[2].mxu0 %v322_v29 }
 0x32a   :  { %v410_v31 = vpop.f32.mrb[2].mxu0 }
 0x32b   :  { %v411_v32 = vadd.f32 %v439_v30, %v410_v31  ;;  %v595_v0 = vpop.f32.mrb[3].mxu0 }
 0x32d   :  { %414 = vst [vmem:[#allocation14] sm:$0xff] %v411_v32 }
 0x32e   :  { %846 = shalt.err (!%p843_p4)
}
 0x32f   :  { %s847_s13 = scalar_lea.hbm %s1062_s7, 128 }
 0x330   :  { %p848_p5 = scmp.ne.s32.totalorder %s1062_s7, %s847_s13  ;;  %p851_p6 = scmp.lt.u32.totalorder %s847_s13, %s1062_s7 }
 0x332   :  { %p853_p7 = pnand %p851_p6, %p848_p5 }
 0x334   :  { %856 = shalt.err (!%p853_p7)
}
 0x335   :  { %424 = dma.vmem_to_hbm [thread:$0]  %s422_s8, 128, %s1062_s7, [#allocation4]  }
 0x336   :  { %865 = dma.done.wait [#allocation4], 128  }
 0x337   :  { %866 = vsyncadd [#allocation4], 4294967168 }
 0x338   :  { %428 = vsyncpa [#allocation3], 1 }
 0x339   :  { %429 = vsyncpa [#allocation6], 1 }
 0x33a   :  { %430 = vsyncpa [#allocation9], 1 }
 0x33b   :  { %431 = vsyncpa [#allocation12], 1 }
 0x33c   :  { %432 = vsyncpa [#allocation4], 1 }

</bundles_post_ra>
